<compile_context>
chip_gen: v6e
topology: v6e:2x2x1
jax: 0.10.0
libtpu: 0.0.40
codegen_flags: <defaults>
</compile_context>

<pallas_src>
import functools

import jax
import jax.numpy as jnp
from jax.experimental import pallas as pl
from jax.experimental.pallas import tpu as pltpu

NUM_CLASSES = 10


def _criterion_kernel(logits_ref, targets_ref,             # in  (C, TB), (1, TB)
                      preds_ref, loss_ref, acc_ref,         # out (1, TB), (1,), (1,)
                      loss_acc, tp_acc, sup_acc, pcnt_acc,  # scratch
                      *, batch, tile, need_mask):
    pid = pl.program_id(0)
    C = logits_ref.shape[0]

    @pl.when(pid == 0)
    def _init():
        loss_acc[...] = jnp.zeros_like(loss_acc)
        tp_acc[...] = jnp.zeros_like(tp_acc)
        sup_acc[...] = jnp.zeros_like(sup_acc)
        pcnt_acc[...] = jnp.zeros_like(pcnt_acc)

    logits = logits_ref[...].astype(jnp.float32)             # (C, TB), classes on sublanes
    tgt = targets_ref[...]                                    # (1, TB) int32

    if need_mask:
        # Ragged final block: the OOB lanes hold arbitrary (possibly NaN)
        # data.  Sanitize BEFORE exp/log and push invalid targets/preds to
        # class id C so all one-hot counts self-mask.
        lane = jax.lax.broadcasted_iota(jnp.int32, (1, tile), 1)
        valid = (pid * tile + lane) < batch                   # (1, TB) bool
        logits = jnp.where(valid, logits, 0.0)
        tgt = jnp.where(valid, tgt, C)

    cls = jax.lax.broadcasted_iota(jnp.int32, (C, tile), 0)   # class id per sublane
    tgt_onehot = (cls == tgt).astype(jnp.float32)             # zeros on invalid lanes

    # ---- cross-entropy, numerically stable; class reductions are 16-deep sublane ops ----
    row_max = jnp.max(logits, axis=0, keepdims=True)          # (1, TB)
    shifted = logits - row_max
    sum_exp = jnp.sum(jnp.exp(shifted), axis=0, keepdims=True)
    tgt_shift = jnp.sum(shifted * tgt_onehot, axis=0, keepdims=True)
    ce = jnp.log(sum_exp) - tgt_shift                         # row_max cancels
    if need_mask:
        ce = jnp.where(valid, ce, 0.0)
    loss_acc[...] += ce

    # ---- argmax fused with the max already computed (first max index on ties) ----
    preds = jnp.min(jnp.where(logits == row_max, cls, C), axis=0, keepdims=True)
    preds_ref[...] = preds.astype(jnp.int32)                  # lane-dense store
    if need_mask:
        preds = jnp.where(valid, preds, C)                    # drop ragged lanes from counts

    # ---- confusion-count partial sums; stay lane-dense, reduce only at finalize ----
    pred_onehot = (cls == preds).astype(jnp.float32)
    tp_acc[...] += pred_onehot * tgt_onehot
    sup_acc[...] += tgt_onehot
    pcnt_acc[...] += pred_onehot

    @pl.when(pid == pl.num_programs(0) - 1)
    def _finalize():
        loss_ref[0] = jnp.sum(loss_acc[...]) / batch
        tp = jnp.sum(tp_acc[...], axis=1, keepdims=True)      # (C, 1)
        sup = jnp.sum(sup_acc[...], axis=1, keepdims=True)
        pcnt = jnp.sum(pcnt_acc[...], axis=1, keepdims=True)
        per_class = jnp.where(sup > 0.0, tp / jnp.maximum(sup, 1.0), 0.0)
        # torchmetrics macro: exclude classes with tp+fp+fn == 0
        # (i.e. no support AND never predicted).
        weight = ((sup + pcnt) > 0.0).astype(jnp.float32)
        acc_ref[0] = jnp.sum(per_class * weight) / jnp.maximum(jnp.sum(weight), 1.0)


def _round_up(x, m):
    return (x + m - 1) // m * m


@functools.partial(jax.jit, static_argnames=("num_classes", "tile_batch"))
def classification_criterion(logits, targets, num_classes=NUM_CLASSES, tile_batch=None):
    """JAX/Pallas equivalent of ClassificationCriterion.forward.

    Args:
      logits:  float array of shape (B, C) (f32 or bf16)
      targets: int array of shape (B,) with class indices in [0, C)
      tile_batch: optional override of the lane-dense batch tile (multiple of 128)
    Returns:
      dict with 'logits', 'targets', 'preds', 'loss', 'acc'
    """
    B, C = logits.shape
    assert C == num_classes

    # Lane-dense batch tile: big enough that per-step DMA dominates the
    # ~0.35 us grid-step overhead, small enough to keep scratch ~8 MiB.
    TB = tile_batch if tile_batch is not None else min(16384, _round_up(B, 128))
    grid = (pl.cdiv(B, TB),)
    need_mask = (B % TB) != 0

    # Batch on the 128-lane axis, classes on sublanes.  allow_input_fusion
    # below lets XLA fuse this transpose into the pallas_call operand instead
    # of a separate HBM round trip.
    logits_t = jnp.transpose(logits, (1, 0))                  # (C, B)
    targets_t = targets.astype(jnp.int32).reshape(1, B)       # (1, B) lane-dense

    kernel = functools.partial(_criterion_kernel, batch=B, tile=TB, need_mask=need_mask)

    itemsize = jnp.dtype(logits.dtype).itemsize
    cost = pl.CostEstimate(
        flops=12 * B * C,
        transcendentals=B * (C + 1),
        bytes_accessed=B * C * itemsize + B * 4 + B * 4 + 8,
    )

    preds_t, loss, acc = pl.pallas_call(
        kernel,
        out_shape=(
            jax.ShapeDtypeStruct((1, B), jnp.int32),          # preds (lane-dense)
            jax.ShapeDtypeStruct((1,), jnp.float32),          # loss (SMEM scalar)
            jax.ShapeDtypeStruct((1,), jnp.float32),          # acc  (SMEM scalar)
        ),
        grid_spec=pltpu.PrefetchScalarGridSpec(
            num_scalar_prefetch=0,
            grid=grid,
            in_specs=[
                pl.BlockSpec((C, TB), lambda i: (0, i)),
                pl.BlockSpec((1, TB), lambda i: (0, i)),
            ],
            out_specs=(
                pl.BlockSpec((1, TB), lambda i: (0, i)),
                pl.BlockSpec(memory_space=pltpu.MemorySpace.SMEM),
                pl.BlockSpec(memory_space=pltpu.MemorySpace.SMEM),
            ),
            scratch_shapes=[
                pltpu.VMEM((1, TB), jnp.float32),             # running per-lane loss sum
                pltpu.VMEM((C, TB), jnp.float32),             # tp partial sums
                pltpu.VMEM((C, TB), jnp.float32),             # support partial sums
                pltpu.VMEM((C, TB), jnp.float32),             # predicted-count partial sums
            ],
        ),
        compiler_params=pltpu.CompilerParams(
            dimension_semantics=("arbitrary",),               # accumulator across batch tiles
            allow_input_fusion=[True, False],                 # fuse the logits transpose
            vmem_limit_bytes=32 << 20,
        ),
        cost_estimate=cost,
    )(logits_t, targets_t)

    return {
        "logits": logits,
        "targets": targets,
        "preds": preds_t[0],
        "loss": loss[0],
        "acc": acc[0],
    }


def _reference(logits, targets):
    """Pure-JAX reference for verification."""
    logp = jax.nn.log_softmax(logits.astype(jnp.float32), axis=1)
    loss = -jnp.mean(jnp.take_along_axis(logp, targets[:, None], axis=1))
    preds = jnp.argmax(logits, axis=1).astype(jnp.int32)
    C = logits.shape[1]
    tp = jnp.zeros(C).at[targets].add(jnp.where(preds == targets, 1.0, 0.0))
    support = jnp.zeros(C).at[targets].add(1.0)
    pred_cnt = jnp.zeros(C).at[preds].add(1.0)
    per_class = jnp.where(support > 0, tp / jnp.maximum(support, 1.0), 0.0)
    w = ((support + pred_cnt) > 0).astype(jnp.float32)
    acc = jnp.sum(per_class * w) / jnp.maximum(jnp.sum(w), 1.0)
    return loss, preds, acc


if __name__ == "__main__":
    key = jax.random.PRNGKey(0)
    k1, k2, k3, k4 = jax.random.split(key, 4)

    # Small-shape smoke test (single ragged tile, B < 128).
    B = 32
    logits = jax.random.normal(k1, (B, NUM_CLASSES), dtype=jnp.float32)
    targets = jax.random.randint(k2, (B,), 0, NUM_CLASSES, dtype=jnp.int32)
    out = classification_criterion(logits, targets)
    jax.block_until_ready(out)
    ref_loss, ref_preds, ref_acc = _reference(logits, targets)
    assert jnp.allclose(out["loss"], ref_loss, atol=1e-5), (out["loss"], ref_loss)
    assert jnp.all(out["preds"] == ref_preds)
    assert jnp.allclose(out["acc"], ref_acc, atol=1e-5), (out["acc"], ref_acc)

    # Multi-tile + ragged-tail path (force tile_batch=128 so grid > 1).
    B2 = 300
    logits2 = jax.random.normal(k3, (B2, NUM_CLASSES), dtype=jnp.float32)
    targets2 = jax.random.randint(k4, (B2,), 0, NUM_CLASSES, dtype=jnp.int32)
    out2 = classification_criterion(logits2, targets2, tile_batch=128)
    jax.block_until_ready(out2)
    ref_loss2, ref_preds2, ref_acc2 = _reference(logits2, targets2)
    assert jnp.allclose(out2["loss"], ref_loss2, atol=1e-5), (out2["loss"], ref_loss2)
    assert jnp.all(out2["preds"] == ref_preds2)
    assert jnp.allclose(out2["acc"], ref_acc2, atol=1e-5), (out2["acc"], ref_acc2)

    print("KERNEL_OK")
</pallas_src>

<mosaic_0001>
module attributes {stable_mosaic.version = 11 : i64} {
  func.func @_criterion_kernel(%arg0: i32, %arg1: memref<10x128xf32, #tpu.memory_space<vmem>>, %arg2: memref<1x128xi32, #tpu.memory_space<vmem>>, %arg3: memref<1x128xi32, #tpu.memory_space<vmem>>, %arg4: memref<1xf32, #tpu.memory_space<smem>>, %arg5: memref<1xf32, #tpu.memory_space<smem>>, %arg6: memref<1x128xf32, #tpu.memory_space<vmem>>, %arg7: memref<10x128xf32, #tpu.memory_space<vmem>>, %arg8: memref<10x128xf32, #tpu.memory_space<vmem>>, %arg9: memref<10x128xf32, #tpu.memory_space<vmem>>) attributes {dimension_semantics = [#tpu.dimension_semantics<arbitrary>], iteration_bounds = array<i64: 1>, scalar_prefetch = 0 : i64, scratch_operands = 4 : i64, tpu.core_type = #tpu.core_type<tc>, window_params = [{transform_indices = @transform_0, window_bounds = array<i64: 10, 128>}, {transform_indices = @transform_1, window_bounds = array<i64: 1, 128>}, {transform_indices = @transform_2, window_bounds = array<i64: 1, 128>}, {transform_indices = @transform_3, window_bounds = array<i64: 1>}, {transform_indices = @transform_4, window_bounds = array<i64: 1>}]} {
    %c0_i32 = arith.constant 0 : i32
    %0 = arith.cmpi eq, %arg0, %c0_i32 : i32
    %1 = arith.extui %0 : i1 to i32
    %c0_i32_0 = arith.constant 0 : i32
    %2 = arith.cmpi ne, %1, %c0_i32_0 : i32
    scf.if %2 {
      %cst_31 = arith.constant 0.000000e+00 : f32
      %65 = vector.broadcast %cst_31 : f32 to vector<1x128xf32>
      %c0_32 = arith.constant 0 : index
      %c0_33 = arith.constant 0 : index
      %66 = vector.load %arg6[%c0_32, %c0_33] : memref<1x128xf32, #tpu.memory_space<vmem>>, vector<1x128xf32>
      tpu.vector_store %arg6[%c0_32, %c0_33], %65 {strides = array<i32>} : memref<1x128xf32, #tpu.memory_space<vmem>>, vector<1x128xf32>,
      %cst_34 = arith.constant 0.000000e+00 : f32
      %67 = vector.broadcast %cst_34 : f32 to vector<10x128xf32>
      %c0_35 = arith.constant 0 : index
      %c0_36 = arith.constant 0 : index
      %68 = vector.load %arg7[%c0_35, %c0_36] : memref<10x128xf32, #tpu.memory_space<vmem>>, vector<10x128xf32>
      tpu.vector_store %arg7[%c0_35, %c0_36], %67 {strides = array<i32>} : memref<10x128xf32, #tpu.memory_space<vmem>>, vector<10x128xf32>,
      %cst_37 = arith.constant 0.000000e+00 : f32
      %69 = vector.broadcast %cst_37 : f32 to vector<10x128xf32>
      %c0_38 = arith.constant 0 : index
      %c0_39 = arith.constant 0 : index
      %70 = vector.load %arg8[%c0_38, %c0_39] : memref<10x128xf32, #tpu.memory_space<vmem>>, vector<10x128xf32>
      tpu.vector_store %arg8[%c0_38, %c0_39], %69 {strides = array<i32>} : memref<10x128xf32, #tpu.memory_space<vmem>>, vector<10x128xf32>,
      %cst_40 = arith.constant 0.000000e+00 : f32
      %71 = vector.broadcast %cst_40 : f32 to vector<10x128xf32>
      %c0_41 = arith.constant 0 : index
      %c0_42 = arith.constant 0 : index
      %72 = vector.load %arg9[%c0_41, %c0_42] : memref<10x128xf32, #tpu.memory_space<vmem>>, vector<10x128xf32>
      tpu.vector_store %arg9[%c0_41, %c0_42], %71 {strides = array<i32>} : memref<10x128xf32, #tpu.memory_space<vmem>>, vector<10x128xf32>,
    } else {
    }
    %c0 = arith.constant 0 : index
    %c0_1 = arith.constant 0 : index
    %3 = vector.load %arg1[%c0, %c0_1] : memref<10x128xf32, #tpu.memory_space<vmem>>, vector<10x128xf32>
    %c0_2 = arith.constant 0 : index
    %c0_3 = arith.constant 0 : index
    %4 = vector.load %arg2[%c0_2, %c0_3] : memref<1x128xi32, #tpu.memory_space<vmem>>, vector<1x128xi32>
    %5 = tpu.iota {dimensions = array<i32: 1>} : vector<1x128xi32>
    %c128_i32 = arith.constant 128 : i32
    %6 = arith.muli %arg0, %c128_i32 : i32
    %7 = vector.broadcast %6 : i32 to vector<1x128xi32>
    %8 = arith.addi %7, %5 : vector<1x128xi32>
    %c32_i32 = arith.constant 32 : i32
    %9 = vector.broadcast %c32_i32 : i32 to vector<1x128xi32>
    %10 = arith.cmpi slt, %8, %9 : vector<1x128xi32>
    %cst = arith.constant 0.000000e+00 : f32
    %11 = vector.shape_cast %10 : vector<1x128xi1> to vector<1x128xi1>
    %12 = vector.broadcast %11 : vector<1x128xi1> to vector<10x128xi1>
    %13 = vector.broadcast %cst : f32 to vector<10x128xf32>
    %14 = arith.select %12, %3, %13 : vector<10x128xi1>, vector<10x128xf32>
    %c10_i32 = arith.constant 10 : i32
    %15 = vector.broadcast %c10_i32 : i32 to vector<1x128xi32>
    %16 = arith.select %10, %4, %15 : vector<1x128xi1>, vector<1x128xi32>
    %17 = tpu.iota {dimensions = array<i32: 0>} : vector<10x128xi32>
    %18 = vector.broadcast %16 : vector<1x128xi32> to vector<10x128xi32>
    %19 = arith.cmpi eq, %17, %18 : vector<10x128xi32>
    %20 = arith.extui %19 : vector<10x128xi1> to vector<10x128xi32>
    %21 = arith.sitofp %20 : vector<10x128xi32> to vector<10x128xf32>
    %cst_4 = arith.constant dense<0xFF800000> : vector<128xf32>
    %22 = vector.multi_reduction <maximumf>, %14, %cst_4 [0] : vector<10x128xf32> to vector<128xf32>
    %23 = vector.shape_cast %22 : vector<128xf32> to vector<1x128xf32>
    %24 = vector.broadcast %23 : vector<1x128xf32> to vector<10x128xf32>
    %25 = arith.subf %14, %24 : vector<10x128xf32>
    %26 = math.exp %25 : vector<10x128xf32>
    %cst_5 = arith.constant dense<0.000000e+00> : vector<128xf32>
    %27 = vector.multi_reduction <add>, %26, %cst_5 [0] : vector<10x128xf32> to vector<128xf32>
    %28 = vector.shape_cast %27 : vector<128xf32> to vector<1x128xf32>
    %29 = arith.mulf %25, %21 : vector<10x128xf32>
    %cst_6 = arith.constant dense<0.000000e+00> : vector<128xf32>
    %30 = vector.multi_reduction <add>, %29, %cst_6 [0] : vector<10x128xf32> to vector<128xf32>
    %31 = vector.shape_cast %30 : vector<128xf32> to vector<1x128xf32>
    %32 = math.log %28 : vector<1x128xf32>
    %33 = arith.subf %32, %31 : vector<1x128xf32>
    %cst_7 = arith.constant 0.000000e+00 : f32
    %34 = vector.broadcast %cst_7 : f32 to vector<1x128xf32>
    %35 = arith.select %10, %33, %34 : vector<1x128xi1>, vector<1x128xf32>
    %c0_8 = arith.constant 0 : index
    %c0_9 = arith.constant 0 : index
    %36 = vector.load %arg6[%c0_8, %c0_9] : memref<1x128xf32, #tpu.memory_space<vmem>>, vector<1x128xf32>
    %37 = arith.addf %36, %35 : vector<1x128xf32>
    %c0_10 = arith.constant 0 : index
    %c0_11 = arith.constant 0 : index
    %38 = vector.load %arg6[%c0_10, %c0_11] : memref<1x128xf32, #tpu.memory_space<vmem>>, vector<1x128xf32>
    tpu.vector_store %arg6[%c0_10, %c0_11], %37 {strides = array<i32>} : memref<1x128xf32, #tpu.memory_space<vmem>>, vector<1x128xf32>,
    %39 = vector.broadcast %23 : vector<1x128xf32> to vector<10x128xf32>
    %40 = arith.cmpf oeq, %14, %39 : vector<10x128xf32>
    %c10_i32_12 = arith.constant 10 : i32
    %41 = vector.broadcast %c10_i32_12 : i32 to vector<10x128xi32>
    %42 = arith.select %40, %17, %41 : vector<10x128xi1>, vector<10x128xi32>
    %cst_13 = arith.constant dense<2147483647> : vector<128xi32>
    %43 = vector.multi_reduction <minsi>, %42, %cst_13 [0] : vector<10x128xi32> to vector<128xi32>
    %44 = vector.shape_cast %43 : vector<128xi32> to vector<1x128xi32>
    %c0_14 = arith.constant 0 : index
    %c0_15 = arith.constant 0 : index
    %45 = vector.load %arg3[%c0_14, %c0_15] : memref<1x128xi32, #tpu.memory_space<vmem>>, vector<1x128xi32>
    tpu.vector_store %arg3[%c0_14, %c0_15], %44 {strides = array<i32>} : memref<1x128xi32, #tpu.memory_space<vmem>>, vector<1x128xi32>,
    %c10_i32_16 = arith.constant 10 : i32
    %46 = vector.broadcast %c10_i32_16 : i32 to vector<1x128xi32>
    %47 = arith.select %10, %44, %46 : vector<1x128xi1>, vector<1x128xi32>
    %48 = vector.broadcast %47 : vector<1x128xi32> to vector<10x128xi32>
    %49 = arith.cmpi eq, %17, %48 : vector<10x128xi32>
    %50 = arith.extui %49 : vector<10x128xi1> to vector<10x128xi32>
    %51 = arith.sitofp %50 : vector<10x128xi32> to vector<10x128xf32>
    %c0_17 = arith.constant 0 : index
    %c0_18 = arith.constant 0 : index
    %52 = vector.load %arg7[%c0_17, %c0_18] : memref<10x128xf32, #tpu.memory_space<vmem>>, vector<10x128xf32>
    %53 = arith.mulf %51, %21 : vector<10x128xf32>
    %54 = arith.addf %52, %53 : vector<10x128xf32>
    %c0_19 = arith.constant 0 : index
    %c0_20 = arith.constant 0 : index
    %55 = vector.load %arg7[%c0_19, %c0_20] : memref<10x128xf32, #tpu.memory_space<vmem>>, vector<10x128xf32>
    tpu.vector_store %arg7[%c0_19, %c0_20], %54 {strides = array<i32>} : memref<10x128xf32, #tpu.memory_space<vmem>>, vector<10x128xf32>,
    %c0_21 = arith.constant 0 : index
    %c0_22 = arith.constant 0 : index
    %56 = vector.load %arg8[%c0_21, %c0_22] : memref<10x128xf32, #tpu.memory_space<vmem>>, vector<10x128xf32>
    %57 = arith.addf %56, %21 : vector<10x128xf32>
    %c0_23 = arith.constant 0 : index
    %c0_24 = arith.constant 0 : index
    %58 = vector.load %arg8[%c0_23, %c0_24] : memref<10x128xf32, #tpu.memory_space<vmem>>, vector<10x128xf32>
    tpu.vector_store %arg8[%c0_23, %c0_24], %57 {strides = array<i32>} : memref<10x128xf32, #tpu.memory_space<vmem>>, vector<10x128xf32>,
    %c0_25 = arith.constant 0 : index
    %c0_26 = arith.constant 0 : index
    %59 = vector.load %arg9[%c0_25, %c0_26] : memref<10x128xf32, #tpu.memory_space<vmem>>, vector<10x128xf32>
    %60 = arith.addf %59, %51 : vector<10x128xf32>
    %c0_27 = arith.constant 0 : index
    %c0_28 = arith.constant 0 : index
    %61 = vector.load %arg9[%c0_27, %c0_28] : memref<10x128xf32, #tpu.memory_space<vmem>>, vector<10x128xf32>
    tpu.vector_store %arg9[%c0_27, %c0_28], %60 {strides = array<i32>} : memref<10x128xf32, #tpu.memory_space<vmem>>, vector<10x128xf32>,
    %c0_i32_29 = arith.constant 0 : i32
    %62 = arith.cmpi eq, %arg0, %c0_i32_29 : i32
    %63 = arith.extui %62 : i1 to i32
    %c0_i32_30 = arith.constant 0 : i32
    %64 = arith.cmpi ne, %63, %c0_i32_30 : i32
    scf.if %64 {
      %c0_31 = arith.constant 0 : index
      %c0_32 = arith.constant 0 : index
      %65 = vector.load %arg6[%c0_31, %c0_32] : memref<1x128xf32, #tpu.memory_space<vmem>>, vector<1x128xf32>
      %66 = vector.shape_cast %65 : vector<1x128xf32> to vector<1x1x128xf32>
      %cst_33 = arith.constant dense<0.000000e+00> : vector<1xf32>
      %67 = vector.multi_reduction <add>, %66, %cst_33 [1, 2] : vector<1x1x128xf32> to vector<1xf32>
      %68 = vector.shape_cast %67 : vector<1xf32> to vector<1x1x1xf32>
      %69 = vector.extract %68[0, 0, 0] : f32 from vector<1x1x1xf32>
      %cst_34 = arith.constant 3.200000e+01 : f32
      %70 = arith.divf %69, %cst_34 : f32
      %c0_35 = arith.constant 0 : index
      %71 = memref.load %arg4[%c0_35] : memref<1xf32, #tpu.memory_space<smem>>
      memref.store %70, %arg4[%c0_35] : memref<1xf32, #tpu.memory_space<smem>>
      %c0_36 = arith.constant 0 : index
      %c0_37 = arith.constant 0 : index
      %72 = vector.load %arg7[%c0_36, %c0_37] : memref<10x128xf32, #tpu.memory_space<vmem>>, vector<10x128xf32>
      %cst_38 = arith.constant dense<0.000000e+00> : vector<10xf32>
      %73 = vector.multi_reduction <add>, %72, %cst_38 [1] : vector<10x128xf32> to vector<10xf32>
      %74 = vector.shape_cast %73 : vector<10xf32> to vector<10x1xf32>
      %c0_39 = arith.constant 0 : index
      %c0_40 = arith.constant 0 : index
      %75 = vector.load %arg8[%c0_39, %c0_40] : memref<10x128xf32, #tpu.memory_space<vmem>>, vector<10x128xf32>
      %cst_41 = arith.constant dense<0.000000e+00> : vector<10xf32>
      %76 = vector.multi_reduction <add>, %75, %cst_41 [1] : vector<10x128xf32> to vector<10xf32>
      %77 = vector.shape_cast %76 : vector<10xf32> to vector<10x1xf32>
      %c0_42 = arith.constant 0 : index
      %c0_43 = arith.constant 0 : index
      %78 = vector.load %arg9[%c0_42, %c0_43] : memref<10x128xf32, #tpu.memory_space<vmem>>, vector<10x128xf32>
      %cst_44 = arith.constant dense<0.000000e+00> : vector<10xf32>
      %79 = vector.multi_reduction <add>, %78, %cst_44 [1] : vector<10x128xf32> to vector<10xf32>
      %80 = vector.shape_cast %79 : vector<10xf32> to vector<10x1xf32>
      %cst_45 = arith.constant 0.000000e+00 : f32
      %81 = vector.broadcast %cst_45 : f32 to vector<10x1xf32>
      %82 = arith.cmpf ogt, %77, %81 : vector<10x1xf32>
      %cst_46 = arith.constant 1.000000e+00 : f32
      %83 = vector.broadcast %cst_46 : f32 to vector<10x1xf32>
      %84 = arith.maximumf %77, %83 : vector<10x1xf32>
      %85 = arith.divf %74, %84 : vector<10x1xf32>
      %cst_47 = arith.constant 0.000000e+00 : f32
      %86 = vector.broadcast %cst_47 : f32 to vector<10x1xf32>
      %87 = arith.select %82, %85, %86 : vector<10x1xi1>, vector<10x1xf32>
      %88 = arith.addf %77, %80 : vector<10x1xf32>
      %cst_48 = arith.constant 0.000000e+00 : f32
      %89 = vector.broadcast %cst_48 : f32 to vector<10x1xf32>
      %90 = arith.cmpf ogt, %88, %89 : vector<10x1xf32>
      %91 = arith.extui %90 : vector<10x1xi1> to vector<10x1xi32>
      %92 = arith.sitofp %91 : vector<10x1xi32> to vector<10x1xf32>
      %93 = arith.mulf %87, %92 : vector<10x1xf32>
      %94 = vector.shape_cast %93 : vector<10x1xf32> to vector<1x10x1xf32>
      %cst_49 = arith.constant dense<0.000000e+00> : vector<1xf32>
      %95 = vector.multi_reduction <add>, %94, %cst_49 [1, 2] : vector<1x10x1xf32> to vector<1xf32>
      %96 = vector.shape_cast %95 : vector<1xf32> to vector<1x1x1xf32>
      %97 = vector.extract %96[0, 0, 0] : f32 from vector<1x1x1xf32>
      %98 = vector.shape_cast %92 : vector<10x1xf32> to vector<1x10x1xf32>
      %cst_50 = arith.constant dense<0.000000e+00> : vector<1xf32>
      %99 = vector.multi_reduction <add>, %98, %cst_50 [1, 2] : vector<1x10x1xf32> to vector<1xf32>
      %100 = vector.shape_cast %99 : vector<1xf32> to vector<1x1x1xf32>
      %101 = vector.extract %100[0, 0, 0] : f32 from vector<1x1x1xf32>
      %cst_51 = arith.constant 1.000000e+00 : f32
      %102 = arith.maximumf %101, %cst_51 : f32
      %103 = arith.divf %97, %102 : f32
      %c0_52 = arith.constant 0 : index
      %104 = memref.load %arg5[%c0_52] : memref<1xf32, #tpu.memory_space<smem>>
      memref.store %103, %arg5[%c0_52] : memref<1xf32, #tpu.memory_space<smem>>
    } else {
    }
    return
  }
  func.func @transform_0(%arg0: i32) -> (i32, i32) {
    %c0_i32 = arith.constant 0 : i32
    %c0_i32_0 = arith.constant 0 : i32
    return %c0_i32, %arg0 : i32, i32
  }
  func.func @transform_1(%arg0: i32) -> (i32, i32) {
    %c0_i32 = arith.constant 0 : i32
    %c0_i32_0 = arith.constant 0 : i32
    return %c0_i32, %arg0 : i32, i32
  }
  func.func @transform_2(%arg0: i32) -> (i32, i32) {
    %c0_i32 = arith.constant 0 : i32
    %c0_i32_0 = arith.constant 0 : i32
    return %c0_i32, %arg0 : i32, i32
  }
  func.func @transform_3(%arg0: i32) -> i32 {
    %c0_i32 = arith.constant 0 : i32
    %c0_i32_0 = arith.constant 0 : i32
    return %c0_i32 : i32
  }
  func.func @transform_4(%arg0: i32) -> i32 {
    %c0_i32 = arith.constant 0 : i32
    %c0_i32_0 = arith.constant 0 : i32
    return %c0_i32 : i32
  }
}

</mosaic_0001>

<bundles_post_ra>
// kernel: classification_criterion.2
= control target key start
LH: loop header
LB: loop body
LE: loop exit
PB: predicated region body
PF: predicated region fallthrough
CT: control target
= control target key end

     0   :  { %10 = vsyncpa [#allocation7], 0  ;;  %s480_s0 = inlined_call_operand.vmem [shape: s32[1,32], index: 0, kind: input, shape index: {}]   ;;  %s481_s1 = inlined_call_operand.hbm [shape: f32[32,10], index: 1, kind: input, shape index: {}]   ;;  %s482_s2 = inlined_call_operand.hbm [shape: s32[1,32], index: 2, kind: output, shape index: {0}]   ;;  %s483_s3 = inlined_call_operand.hbm [shape: f32[1], index: 3, kind: output, shape index: {1}]   ;;  %s484_s4 = inlined_call_operand.hbm [shape: f32[1], index: 4, kind: output, shape index: {2}]  }
   0x1   :  { %11 = vsyncpa [#allocation8], 0 }
   0x2   :  { %12 = vsyncpa [#allocation9], 0 }
   0x3   :  { %13 = vsyncpa [#allocation13], 0  ;;  %s395_s15 = smov [#allocation6]  }
   0x4   :  { %s19_s16 = sshll.u32 %s395_s15, 4  ;;  %s20_s16 = int_to_ptr.vmem [resolvable:$true] %s19_s16 }
   0x5   :  { %s339_s17 = scalar_lea.vmem %s20_s16, 256  ;;  %p344_p1 = scmp.lt.s32.totalorder %s20_s16, %s20_s16 }
   0x6   :  { %p340_p0 = scmp.ne.s32.totalorder %s20_s16, %s339_s17  ;;  %p345_p2 = scmp.lt.s32.totalorder %s339_s17, %s339_s17 }
   0x8   :  { %p346_p3 = por %p345_p2, %p344_p1 }
   0xa   :  { %p347_p4 = pnand %p346_p3, %p340_p0 }
   0xc   :  { %350 = shalt.err (!%p347_p4)
}
   0xd   :  { %s396_s18 = smov 128   ;;  %s397_s19 = smov 8  }
   0xe   :  { %25 = dma.hbm_to_vmem [thread:$0]  %s481_s1, 256, %s20_s16, [#allocation7], %s396_s18, %s396_s18, %s397_s19  }
   0xf   :  { %387 = dma.done.wait [#allocation7], 256  }
  0x10   :  { %388 = vsyncadd [#allocation7], 4294967040  ;;  %v55_v0 = vlaneseq  ;;  %v398_v1 = vmov 0.0   ;;  %v54_v5 = vld [vmem:[%s480_s0] sm:$0x1]  ;;  %v31_v6 = vld [vmem:[#allocation6] sm:$0xff] }
  0x11   :  { %45 = vst [vmem:[#allocation2] sm:$0x1] %v398_v1  ;;  %47 = vst [vmem:[#allocation3 + $0x8] sm:$0x3] %v398_v1  ;;  %v36_v7 = vld [vmem:[#allocation6 + $0x8] sm:$0xff]  ;;  %vm79_vm3 = vcmask 1041408  }
  0x12   :  { %49 = vst [vmem:[#allocation4] sm:$0x3] %v398_v1  ;;  %51 = vst [vmem:[#allocation5] sm:$0x3] %v398_v1  ;;  %v435_v2 = vshrl.u32 %v55_v0, 7  ;;  %v437_v3 = vand.u32 127, %v55_v0 }
  0x13   :  { %40 = vst [vmem:[#allocation14 + $0x8] sm:$0xff] %v36_v7  ;;  %vm167_vm12 = vcmask 1040384   ;;  %vm224_vm15 = vcmask 7168   ;;  %s399_s24 = smov [#allocation10]  }
  0x14   :  { %v71_v4 = vsub.s32 0, %v435_v2  ;;  %vm60_vm0 = vcmp.lt.s32.totalorder %v437_v3, 32  ;;  %v68_v10 = vadd.s32 8, %v435_v2  ;;  %s263_s25 = sshll.u32 %s399_s24, 4  ;;  %s264_s25 = int_to_ptr.vmem [resolvable:$true] %s263_s25 }
  0x15   :  { %v65_v8 = vsel %vm60_vm0, %v54_v5, 10  ;;  %v63_v16 = vsel %vm60_vm0, %v31_v6, 0.0  ;;  %s351_s26 = scalar_lea.vmem %s264_s25, 16  ;;  %s355_s27 = scalar_lea.vmem %s264_s25, 32 }
  0x16   :  { %v72_v9 = vrot.slane %v65_v8, %v71_v4  ;;  %p352_p5 = scmp.ne.s32.totalorder %s264_s25, %s351_s26  ;;  %p356_p6 = scmp.lt.s32.totalorder %s264_s25, %s264_s25 }
  0x17   :  { %p357_p7 = scmp.lt.s32.totalorder %s355_s27, %s351_s26 }
  0x18   :  { %vm73_vm1 = vcmp.eq.s32.totalorder %v435_v2, %v72_v9  ;;  %vm74_vm2 = vcmp.eq.s32.totalorder %v68_v10, %v72_v9  ;;  %v144_v53 = vld [vmem:[#allocation3 + $0x8] sm:$0x3] }
  0x19   :  { %v152_v11 = vld [vmem:[#allocation4] sm:$0x3]  ;;  %v297_v12 = vsel %vm73_vm1, 1.0, %v398_v1  ;;  %v298_v13 = vsel %vm74_vm2, 1.0, %v398_v1  ;;  %v158_v45 = vld [vmem:[#allocation5] sm:$0x3]  ;;  %p358_p8 = por %p357_p7, %p356_p6 }
  0x1a   :  { %v154_v14 = vadd.f32 %v298_v13, %v152_v11  ;;  %192 = vadd.xlane.f32.xlu0 %v297_v12  ;;  %v53_v15 = vld [vmem:[#allocation14 + $0x8] sm:$0x3] }
  0x1b   :  { %v64_v17 = vsel %vm60_vm0, %v53_v15, 0.0  ;;  %p359_p9 = pnand %p358_p8, %p352_p5 }
  0x1c   :  { %156 = vst [vmem:[#allocation4] sm:$0x3] %v154_v14  ;;  %v80_v18 = vsel %vm79_vm3, %v64_v17, -inf }
  0x1d   :  { %v81_v19 = vmax.f32 %v63_v16, %v80_v18 }
  0x1f   :  { %v82_v20 = vrot.slane %v81_v19, 4 }
  0x21   :  { %v83_v22 = vmax.f32 %v81_v19, %v82_v20 }
  0x23   :  { %v191_v21 = vld [vmem:[#allocation4] sm:$0x3]  ;;  %v84_v24 = vrot.slane %v83_v22, 2 }
  0x24   :  { %v194_v23 = vsel %vm79_vm3, %v191_v21, 0.0 }
  0x25   :  { %195 = vadd.xlane.f32.xlu0 %v194_v23  ;;  %v85_v25 = vmax.f32 %v83_v22, %v84_v24 }
  0x27   :  { %v86_v26 = vrot.slane %v85_v25, 1 }
  0x29   :  { %v87_v27 = vmax.f32 %v85_v25, %v86_v26 }
  0x2b   :  { %v88_v28 = vsub.f32 %v63_v16, %v87_v27  ;;  %v89_v29 = vsub.f32 %v64_v17, %v87_v27  ;;  %vm119_vm4 = vcmp.eq.f32.partialorder %v63_v16, %v87_v27  ;;  %vm120_vm5 = vcmp.eq.f32.partialorder %v64_v17, %v87_v27  ;;  %v116_v16 = vld [vmem:[#allocation2] sm:$0x1] }
  0x2c   :  { %v121_v30 = vsel %vm119_vm4, %v435_v2, 10  ;;  %v122_v31 = vsel %vm120_vm5, %v68_v10, 10 }
  0x2d   :  { %v90_v32 = vmul.f32 1.442695, %v88_v28  ;;  %v92_v33 = vmul.f32 1.442695, %v89_v29  ;;  %v123_v34 = vsel %vm79_vm3, %v122_v31, 2147483647  ;;  %v103_v41 = vmul.f32 %v298_v13, %v89_v29 }
  0x2e   :  { %vm124_vm6 = vcmp.lt.s32.totalorder %v121_v30, %v123_v34  ;;  %v102_v46 = vmul.f32 %v297_v12, %v88_v28 }
  0x2f   :  { %319 = vpow2.f32 %v90_v32  ;;  %v125_v35 = vsel %vm124_vm6, %v121_v30, %v123_v34  ;;  %v104_v49 = vsel %vm79_vm3, %v103_v41, 0.0 }
  0x30   :  { %321 = vpow2.f32 %v92_v33  ;;  %v126_v36 = vrot.slane %v125_v35, 4  ;;  %v105_v58 = vadd.f32 %v104_v49, %v102_v46 }
  0x32   :  { %vm127_vm7 = vcmp.lt.s32.totalorder %v125_v35, %v126_v36  ;;  %v106_v62 = vrot.slane %v105_v58, 4 }
  0x33   :  { %v128_v37 = vsel %vm127_vm7, %v125_v35, %v126_v36 }
  0x34   :  { %v129_v38 = vrot.slane %v128_v37, 2 }
  0x36   :  { %vm130_vm8 = vcmp.lt.s32.totalorder %v128_v37, %v129_v38 }
  0x37   :  { %v131_v39 = vsel %vm130_vm8, %v128_v37, %v129_v38 }
  0x38   :  { %v132_v40 = vrot.slane %v131_v39, 1 }
  0x3a   :  { %vm133_vm9 = vcmp.lt.s32.totalorder %v131_v39, %v132_v40 }
  0x3b   :  { %v134_v43 = vsel %vm133_vm9, %v131_v39, %v132_v40 }
  0x3c   :  { %v320_v42 = vpop.eup %319  ;;  %v136_v47 = vsel %vm60_vm0, %v134_v43, 10  ;;  %135 = vst [vmem:[#allocation10] sm:$0x1] %v134_v43 }
  0x3d   :  { %v322_v44 = vpop.eup %321  ;;  %vm137_vm10 = vcmp.eq.s32.totalorder %v435_v2, %v136_v47  ;;  %vm138_vm11 = vcmp.eq.s32.totalorder %v68_v10, %v136_v47  ;;  %v107_v2 = vadd.f32 %v106_v62, %v105_v58 }
  0x3e   :  { %v94_v48 = vsel %vm79_vm3, %v322_v44, 0.0  ;;  %v299_v51 = vsel %vm137_vm10, 1.0, %v398_v1  ;;  %v300_v52 = vsel %vm138_vm11, 1.0, %v398_v1 }
  0x3f   :  { %v95_v50 = vadd.f32 %v320_v42, %v94_v48  ;;  %v145_v54 = vmul.f32 %v299_v51, %v297_v12  ;;  %v146_v55 = vmul.f32 %v300_v52, %v298_v13  ;;  %v160_v56 = vadd.f32 %v300_v52, %v158_v45  ;;  %199 = vadd.xlane.f32.xlu1 %v299_v51 }
  0x40   :  { %v108_v9 = vrot.slane %v107_v2, 2 }
  0x41   :  { %v96_v57 = vrot.slane %v95_v50, 4  ;;  %v148_v59 = vadd.f32 %v146_v55, %v144_v53  ;;  %162 = vst [vmem:[#allocation5] sm:$0x3] %v160_v56  ;;  %185 = vadd.xlane.f32.xlu0 %v145_v54 }
  0x42   :  { %v109_v10 = vadd.f32 %v108_v9, %v107_v2 }
  0x43   :  { %v97_v60 = vadd.f32 %v96_v57, %v95_v50  ;;  %150 = vst [vmem:[#allocation3 + $0x8] sm:$0x3] %v148_v59 }
  0x44   :  { %v110_v11 = vrot.slane %v109_v10, 1 }
  0x45   :  { %v98_v61 = vrot.slane %v97_v60, 2 }
  0x46   :  { %v111_v12 = vadd.f32 %v110_v11, %v109_v10 }
  0x47   :  { %v99_v63 = vadd.f32 %v98_v61, %v97_v60 }
  0x48   :  { %v198_v4 = vld [vmem:[#allocation5] sm:$0x3] }
  0x49   :  { %v100_v0 = vrot.slane %v99_v63, 1  ;;  %v201_v5 = vsel %vm79_vm3, %v198_v4, 0.0 }
  0x4a   :  { %202 = vadd.xlane.f32.xlu1 %v201_v5  ;;  %v184_v7 = vld [vmem:[#allocation3 + $0x8] sm:$0x3] }
  0x4b   :  { %v101_v6 = vadd.f32 %v100_v0, %v99_v63  ;;  %v187_v8 = vsel %vm79_vm3, %v184_v7, 0.0 }
  0x4d   :  { %323 = vlog2.f32 %v101_v6 }
  0x4e   :  { %188 = vadd.xlane.f32.xlu1 %v187_v8 }
  0x5a   :  { %v324_v13 = vpop.eup %323 }
  0x5b   :  { %v113_v14 = vmul.f32 0.6931472, %v324_v13 }
  0x5d   :  { %v114_v15 = vsub.f32 %v113_v14, %v111_v12 }
  0x5f   :  { %v115_v17 = vsel %vm60_vm0, %v114_v15, 0.0  ;;  %vm226_vm0 = vcmask 1024  }
  0x60   :  { %v117_v18 = vadd.f32 %v116_v16, %v115_v17 }
  0x62   :  { %118 = vst [vmem:[#allocation2] sm:$0x1] %v117_v18 }
  0x69   :  { %v166_v19 = vld [vmem:[#allocation2] sm:$0x1] }
  0x6a   :  { %v168_v20 = vsel %vm167_vm12, %v166_v19, 0.0 }
  0x6b   :  { %169 = vadd.xlane.f32.xlu0 %v168_v20 }
  0xa3   :  { %v193_v21 = vpop.xlane.xlu0 %192 }
  0xa4   :  { %v206_v22 = vmax.f32 %v193_v21, 1.0  ;;  %vm204_vm14 = vcmp.gt.f32.partialorder %v193_v21, 0.0 }
  0xa6   :  { %325 = vrcp.f32 %v206_v22 }
  0xae   :  { %v196_v23 = vpop.xlane.xlu0 %195 }
  0xaf   :  { %v207_v24 = vmax.f32 %v196_v23, 1.0  ;;  %vm205_vm2 = vcmp.gt.f32.partialorder %v196_v23, 0.0 }
  0xb1   :  { %327 = vrcp.f32 %v207_v24 }
  0xb3   :  { %v326_v27 = vpop.eup %325 }
  0xbe   :  { %v328_v31 = vpop.eup %327 }
  0xc8   :  { %v200_v25 = vpop.xlane.xlu1 %199 }
  0xc9   :  { %v214_v26 = vadd.f32 %v200_v25, %v193_v21 }
  0xca   :  { %v186_v28 = vpop.xlane.xlu0 %185 }
  0xcb   :  { %vm216_vm13 = vcmp.gt.f32.partialorder %v214_v26, 0.0  ;;  %v209_v29 = vmul.f32 %v326_v27, %v186_v28 }
  0xcc   :  { %v301_v32 = vsel %vm216_vm13, 1.0, %v398_v1 }
  0xcd   :  { %v212_v33 = vsel %vm204_vm14, %v209_v29, 0.0  ;;  %v238_v37 = vsel %vm224_vm15, %v301_v32, 0.0 }
  0xce   :  { %v222_v39 = vmul.f32 %v301_v32, %v212_v33 }
  0xd0   :  { %v225_v43 = vsel %vm224_vm15, %v222_v39, 0.0 }
  0xd3   :  { %v203_v3 = vpop.xlane.xlu1 %202 }
  0xd4   :  { %v215_v30 = vadd.f32 %v203_v3, %v196_v23 }
  0xd6   :  { %vm217_vm1 = vcmp.gt.f32.partialorder %v215_v30, 0.0 }
  0xd7   :  { %v302_v34 = vsel %vm217_vm1, 1.0, %v398_v1  ;;  %v189_v35 = vpop.xlane.xlu1 %188 }
  0xd8   :  { %v211_v36 = vmul.f32 %v328_v31, %v189_v35  ;;  %v239_v38 = vsel %vm226_vm0, %v302_v34, 0.0 }
  0xd9   :  { %v240_v40 = vadd.f32 %v239_v38, %v238_v37 }
  0xda   :  { %v213_v41 = vsel %vm205_vm2, %v211_v36, 0.0 }
  0xdb   :  { %v223_v42 = vmul.f32 %v302_v34, %v213_v41  ;;  %241 = vadd.xlane.f32.xlu0 %v240_v40 }
  0xdd   :  { %v227_v44 = vsel %vm226_vm0, %v223_v42, 0.0 }
  0xde   :  { %v228_v45 = vadd.f32 %v227_v44, %v225_v43 }
  0xe0   :  { %229 = vadd.xlane.f32.xlu1 %v228_v45 }
  0xf4   :  { %v170_v46 = vpop.xlane.xlu0 %169 }
  0xf5   :  { %v171_v47 = vrot.slane %v170_v46, 4 }
  0xf7   :  { %v172_v48 = vadd.f32 %v171_v47, %v170_v46 }
  0xf9   :  { %v173_v49 = vrot.slane %v172_v48, 2 }
  0xfb   :  { %v174_v50 = vadd.f32 %v173_v49, %v172_v48 }
  0xfd   :  { %v175_v1 = vrot.slane %v174_v50, 1 }
  0xff   :  { %v176_v51 = vadd.f32 %v175_v1, %v174_v50 }
 0x101   :  { %303 = vpush %v176_v51 }
 0x132   :  { %s304_s0 = spop %303 }
 0x133   :  { %s180_s23 = smul.f32 0.03125, %s304_s0 }
 0x135   :  { %182 = sst [smem:[#allocation11]] %s180_s23 }
 0x164   :  { %v242_v52 = vpop.xlane.xlu0 %241 }
 0x165   :  { %v243_v53 = vrot.slane %v242_v52, 4 }
 0x167   :  { %v244_v54 = vadd.f32 %v243_v53, %v242_v52 }
 0x169   :  { %v245_v55 = vrot.slane %v244_v54, 2  ;;  %v230_v56 = vpop.xlane.xlu1 %229 }
 0x16a   :  { %v231_v57 = vrot.slane %v230_v56, 4 }
 0x16b   :  { %v246_v59 = vadd.f32 %v245_v55, %v244_v54 }
 0x16c   :  { %v232_v58 = vadd.f32 %v231_v57, %v230_v56 }
 0x16e   :  { %v233_v60 = vrot.slane %v232_v58, 2 }
 0x16f   :  { %362 = shalt.err (!%p359_p9)
}
 0x170   :  { %266 = dma.vmem_to_hbm [thread:$0]  %s264_s25, 16, %s482_s2, [#allocation8]   ;;  %v234_v61 = vadd.f32 %v233_v60, %v232_v58  ;;  %v247_v62 = vrot.slane %v246_v59, 1 }
 0x171   :  { %s400_s30 = smov [#allocation11]   ;;  %s401_s9 = smov 1.0  }
 0x172   :  { %274 = dma.smem_to_hbm %s400_s30, 16, %s483_s3, [#allocation9]   ;;  %v235_v63 = vrot.slane %v234_v61, 1  ;;  %v248_v2 = vadd.f32 %v247_v62, %v246_v59 }
 0x173   :  { %s402_s12 = smov [#allocation12]  }
 0x174   :  { %v236_v0 = vadd.f32 %v235_v63, %v234_v61 }
 0x176   :  { %305 = vpush %v236_v0 }
 0x177   :  { %307 = vpush %v248_v2 }
 0x1a7   :  { %s306_s7 = spop %305 }
 0x1a8   :  { %s308_s8 = spop %307 }
 0x1a9   :  { %s250_s10 = smax.f32 %s401_s9, %s308_s8 }
 0x1aa   :  { %v251_v4 = vstv %s250_s10 }
 0x1ab   :  { %329 = vrcp.f32 %v251_v4 }
 0x1b8   :  { %v330_v5 = vpop.eup %329 }
 0x1b9   :  { %309 = vpush %v330_v5 }
 0x1ea   :  { %s310_s2 = spop %309 }
 0x1eb   :  { %s254_s11 = smul.f32 %s310_s2, %s306_s7 }
 0x1ed   :  { %256 = sst [smem:[#allocation12]] %s254_s11 }
 0x1ee   :  { %282 = dma.smem_to_hbm %s402_s12, 16, %s484_s4, [#allocation13]  }
 0x1ef   :  { %389 = dma.done.wait [#allocation8], 16  }
 0x1f0   :  { %390 = vsyncadd [#allocation8], 4294967280 }
 0x1f1   :  { %391 = dma.done.wait [#allocation9], 16  }
 0x1f2   :  { %392 = vsyncadd [#allocation9], 4294967280 }
 0x1f3   :  { %393 = dma.done.wait [#allocation13], 16  }
 0x1f4   :  { %394 = vsyncadd [#allocation13], 4294967280 }
 0x1f5   :  { %292 = sfence }
 0x1f6   :  { %293 = vsyncpa [#allocation7], 1 }
 0x1f7   :  { %294 = vsyncpa [#allocation8], 1 }
 0x1f8   :  { %295 = vsyncpa [#allocation9], 1 }
 0x1f9   :  { %296 = vsyncpa [#allocation13], 1 }

</bundles_post_ra>
